<compile_context>
chip_gen: v6e
topology: v6e:2x2x1
jax: 0.10.0
libtpu: 0.0.40
codegen_flags: <defaults>
</compile_context>

<pallas_src>
import functools

import jax
import jax.numpy as jnp
from jax.experimental import pallas as pl
from jax.experimental.pallas import tpu as pltpu


def fcn_var_kernel(xt_ref, w1t_ref, b1_ref, w2t_ref, b2_ref, w3_ref, b3_ref, o_ref):
    """One batch tile (feature-major): 2 MXU dots + VPU/XLU/EUP tail, all in VMEM."""
    # Layer 1: h1^T = relu(W1^T @ x^T + b1), single merged K=input_dim dot.
    h1 = jnp.dot(w1t_ref[...], xt_ref[...], preferred_element_type=jnp.float32)
    h1 = jnp.maximum(h1 + b1_ref[...], 0.0)                       # b1 is (H, 1)

    # Layer 2: h2^T = relu(W2^T @ h1^T + b2).
    h2 = jnp.dot(w2t_ref[...], h1, preferred_element_type=jnp.float32)
    h2 = jnp.maximum(h2 + b2_ref[...], 0.0)

    # Layer 3 (H -> 1): VPU multiply + cross-sublane reduction -> lane-dense (1, TB).
    z = jnp.sum(h2 * w3_ref[...], axis=0, keepdims=True) + b3_ref[...]

    # Sigmoid: exp lowers to the otherwise idle EUP slot; exact reciprocal keeps
    # full f32 accuracy.
    o_ref[...] = pl.reciprocal(1.0 + jnp.exp(-z), approx=False)


def _round_up(x, m):
    return ((x + m - 1) // m) * m


@functools.partial(jax.jit, static_argnames=("tb_max",))
def fcn_var_forward(tables, samples, predicates, joins, params, *, tb_max=8192):
    w1, b1, w2, b2, w3, b3 = params
    f32 = jnp.float32

    # Feature-major slab: one fused XLA transpose+concat replaces torch.cat(..., 1)
    # and gives the kernel a dense (input_dim, B) stream with batch on lanes.
    x_t = jnp.concatenate(
        [tables.T.astype(f32), samples.T.astype(f32),
         predicates.T.astype(f32), joins.T.astype(f32)], axis=0)   # (input_dim, B)
    input_dim, B = x_t.shape
    hid = w1.shape[1]

    # Transposed / column-shaped parameter views (tiny, stay VMEM-resident).
    w1_t = jnp.asarray(w1, f32).T                 # (H, input_dim)
    w2_t = jnp.asarray(w2, f32).T                 # (H, H)
    b1_c = jnp.reshape(jnp.asarray(b1, f32), (hid, 1))
    b2_c = jnp.reshape(jnp.asarray(b2, f32), (hid, 1))
    w3_c = jnp.reshape(jnp.asarray(w3, f32), (hid, 1))
    b3_c = jnp.reshape(jnp.asarray(b3, f32), (1, 1))

    # Batch (lane) tile: full array for tiny batches; otherwise a 128-aligned tile,
    # capped at tb_max and at ceil(B/2) so v7x megacore sees >= 2 parallel tiles.
    if B <= 128:
        tb = B
    else:
        tb = min(max(tb_max, 128), _round_up(pl.cdiv(B, 2), 128))
        tb = (tb // 128) * 128                    # lane-dim blocks must be 128-aligned
    grid = (pl.cdiv(B, tb),)

    def const_spec(shape):
        # Same block every grid step -> stays resident in VMEM (no re-DMA).
        return pl.BlockSpec(shape, lambda i: (0, 0))

    out = pl.pallas_call(
        fcn_var_kernel,
        out_shape=jax.ShapeDtypeStruct((1, B), jnp.float32),
        grid=grid,
        in_specs=[
            pl.BlockSpec((input_dim, tb), lambda i: (0, i)),       # x^T batch tile
            const_spec(w1_t.shape), const_spec(b1_c.shape),
            const_spec(w2_t.shape), const_spec(b2_c.shape),
            const_spec(w3_c.shape), const_spec(b3_c.shape),
        ],
        out_specs=pl.BlockSpec((1, tb), lambda i: (0, i)),          # lane-dense output
        compiler_params=pltpu.CompilerParams(
            # Batch tiles are independent -> shard across both TCs on v7x.
            dimension_semantics=("parallel",),
        ),
    )(x_t, w1_t, b1_c, w2_t, b2_c, w3_c, b3_c)

    # (1, B) -> (B, 1): free relayout, preserves the module's output shape.
    return jnp.reshape(out, (B, 1))


def init_params(key, input_dim, hid_units):
    # Deterministic init mimicking nn.Linear default: U(-1/sqrt(fan_in), 1/sqrt(fan_in)).
    ks = jax.random.split(key, 6)

    def lin(kw, kb, fan_in, fan_out):
        bound = 1.0 / jnp.sqrt(fan_in)
        w = jax.random.uniform(kw, (fan_in, fan_out), jnp.float32, -bound, bound)
        b = jax.random.uniform(kb, (1, fan_out), jnp.float32, -bound, bound)
        return w, b

    w1, b1 = lin(ks[0], ks[1], input_dim, hid_units)
    w2, b2 = lin(ks[2], ks[3], hid_units, hid_units)
    w3, b3 = lin(ks[4], ks[5], hid_units, 1)
    return (w1, b1, w2, b2, w3, b3)


def reference_forward(tables, samples, predicates, joins, params):
    w1, b1, w2, b2, w3, b3 = params
    x = jnp.concatenate((tables, samples, predicates, joins), axis=1).astype(jnp.float32)
    h = jax.nn.relu(x @ w1 + b1)
    h = jax.nn.relu(h @ w2 + b2)
    return jax.nn.sigmoid(h @ w3 + b3)


if __name__ == "__main__":
    # Small shapes consistent with the module:
    #   table_feats=4, sample_feats=8, predicate_feats=12, join_feats=8, hid_units=32
    #   input_dim = 4 + 4*8 + 12 + 8 = 56
    table_feats, sample_feats, predicate_feats, join_feats, hid_units = 4, 8, 12, 8, 32
    input_dim = table_feats + table_feats * sample_feats + predicate_feats + join_feats

    key = jax.random.PRNGKey(0)
    k_params, k_data = jax.random.split(key)
    params = init_params(k_params, input_dim, hid_units)

    def make_inputs(k, batch):
        kt, ks, kp, kj = jax.random.split(k, 4)
        tables = jax.random.normal(kt, (batch, table_feats), jnp.float32)
        samples = jax.random.normal(ks, (batch, table_feats * sample_feats), jnp.float32)
        predicates = jax.random.normal(kp, (batch, predicate_feats), jnp.float32)
        joins = jax.random.normal(kj, (batch, join_feats), jnp.float32)
        return tables, samples, predicates, joins

    k1, k2 = jax.random.split(k_data)

    # 1) Small single-tile case (batch=2): every block equals the full array.
    inp = make_inputs(k1, 2)
    out = jax.block_until_ready(fcn_var_forward(*inp, params))
    ref = reference_forward(*inp, params)
    assert out.shape == (2, 1)
    assert jnp.allclose(out, ref, atol=1e-5, rtol=1e-5), (out, ref)

    # 2) Multi-tile case exercising the lane-tiled batch grid: tb_max=128 gives
    #    3 tiles (128, 128, ragged 44) and exercises the masked last-tile writeback.
    inp300 = make_inputs(k2, 300)
    out300 = jax.block_until_ready(fcn_var_forward(*inp300, params, tb_max=128))
    ref300 = reference_forward(*inp300, params)
    assert out300.shape == (300, 1)
    assert jnp.allclose(out300, ref300, atol=1e-5, rtol=1e-5), (out300, ref300)

    print("KERNEL_OK")
</pallas_src>

<mosaic_0001>
module attributes {stable_mosaic.version = 11 : i64} {
  func.func @fcn_var_kernel(%arg0: i32, %arg1: memref<56x2xf32, #tpu.memory_space<vmem>>, %arg2: memref<32x56xf32, #tpu.memory_space<vmem>>, %arg3: memref<32x1xf32, #tpu.memory_space<vmem>>, %arg4: memref<32x32xf32, #tpu.memory_space<vmem>>, %arg5: memref<32x1xf32, #tpu.memory_space<vmem>>, %arg6: memref<32x1xf32, #tpu.memory_space<vmem>>, %arg7: memref<1x1xf32, #tpu.memory_space<vmem>>, %arg8: memref<1x2xf32, #tpu.memory_space<vmem>>) attributes {dimension_semantics = [#tpu.dimension_semantics<parallel>], iteration_bounds = array<i64: 1>, scalar_prefetch = 0 : i64, scratch_operands = 0 : i64, tpu.core_type = #tpu.core_type<tc>, window_params = [{transform_indices = @transform_0, window_bounds = array<i64: 56, 2>}, {pipeline_mode = #tpu.pipeline_mode<synchronous>, transform_indices = @transform_1, window_bounds = array<i64: 32, 56>}, {pipeline_mode = #tpu.pipeline_mode<synchronous>, transform_indices = @transform_2, window_bounds = array<i64: 32, 1>}, {pipeline_mode = #tpu.pipeline_mode<synchronous>, transform_indices = @transform_3, window_bounds = array<i64: 32, 32>}, {pipeline_mode = #tpu.pipeline_mode<synchronous>, transform_indices = @transform_4, window_bounds = array<i64: 32, 1>}, {pipeline_mode = #tpu.pipeline_mode<synchronous>, transform_indices = @transform_5, window_bounds = array<i64: 32, 1>}, {pipeline_mode = #tpu.pipeline_mode<synchronous>, transform_indices = @transform_6, window_bounds = array<i64: 1, 1>}, {transform_indices = @transform_7, window_bounds = array<i64: 1, 2>}]} {
    %c0 = arith.constant 0 : index
    %c0_0 = arith.constant 0 : index
    %0 = vector.load %arg2[%c0, %c0_0] : memref<32x56xf32, #tpu.memory_space<vmem>>, vector<32x56xf32>
    %c0_1 = arith.constant 0 : index
    %c0_2 = arith.constant 0 : index
    %1 = vector.load %arg1[%c0_1, %c0_2] : memref<56x2xf32, #tpu.memory_space<vmem>>, vector<56x2xf32>
    %cst = arith.constant dense<0.000000e+00> : vector<32x2xf32>
    %2 = tpu.matmul %0, %1, %cst {dimension_numbers = #tpu.dot_dimension_numbers<[1], [0], [0], [1], [0, 0, 1, 1], [], []>} : vector<32x56xf32>, vector<56x2xf32>, vector<32x2xf32> -> vector<32x2xf32>
    %c0_3 = arith.constant 0 : index
    %c0_4 = arith.constant 0 : index
    %3 = vector.load %arg3[%c0_3, %c0_4] : memref<32x1xf32, #tpu.memory_space<vmem>>, vector<32x1xf32>
    %4 = vector.broadcast %3 : vector<32x1xf32> to vector<32x2xf32>
    %5 = arith.addf %2, %4 : vector<32x2xf32>
    %cst_5 = arith.constant 0.000000e+00 : f32
    %6 = vector.broadcast %cst_5 : f32 to vector<32x2xf32>
    %7 = arith.maximumf %5, %6 : vector<32x2xf32>
    %c0_6 = arith.constant 0 : index
    %c0_7 = arith.constant 0 : index
    %8 = vector.load %arg4[%c0_6, %c0_7] : memref<32x32xf32, #tpu.memory_space<vmem>>, vector<32x32xf32>
    %cst_8 = arith.constant dense<0.000000e+00> : vector<32x2xf32>
    %9 = tpu.matmul %8, %7, %cst_8 {dimension_numbers = #tpu.dot_dimension_numbers<[1], [0], [0], [1], [0, 0, 1, 1], [], []>} : vector<32x32xf32>, vector<32x2xf32>, vector<32x2xf32> -> vector<32x2xf32>
    %c0_9 = arith.constant 0 : index
    %c0_10 = arith.constant 0 : index
    %10 = vector.load %arg5[%c0_9, %c0_10] : memref<32x1xf32, #tpu.memory_space<vmem>>, vector<32x1xf32>
    %11 = vector.broadcast %10 : vector<32x1xf32> to vector<32x2xf32>
    %12 = arith.addf %9, %11 : vector<32x2xf32>
    %cst_11 = arith.constant 0.000000e+00 : f32
    %13 = vector.broadcast %cst_11 : f32 to vector<32x2xf32>
    %14 = arith.maximumf %12, %13 : vector<32x2xf32>
    %c0_12 = arith.constant 0 : index
    %c0_13 = arith.constant 0 : index
    %15 = vector.load %arg6[%c0_12, %c0_13] : memref<32x1xf32, #tpu.memory_space<vmem>>, vector<32x1xf32>
    %16 = vector.broadcast %15 : vector<32x1xf32> to vector<32x2xf32>
    %17 = arith.mulf %14, %16 : vector<32x2xf32>
    %cst_14 = arith.constant dense<0.000000e+00> : vector<2xf32>
    %18 = vector.multi_reduction <add>, %17, %cst_14 [0] : vector<32x2xf32> to vector<2xf32>
    %19 = vector.shape_cast %18 : vector<2xf32> to vector<1x2xf32>
    %c0_15 = arith.constant 0 : index
    %c0_16 = arith.constant 0 : index
    %20 = vector.load %arg7[%c0_15, %c0_16] : memref<1x1xf32, #tpu.memory_space<vmem>>, vector<1x1xf32>
    %21 = vector.broadcast %20 : vector<1x1xf32> to vector<1x2xf32>
    %22 = arith.addf %19, %21 : vector<1x2xf32>
    %cst_17 = arith.constant 0.000000e+00 : f32
    %23 = vector.broadcast %cst_17 : f32 to vector<1x2xf32>
    %24 = arith.subf %23, %22 : vector<1x2xf32>
    %25 = math.exp %24 : vector<1x2xf32>
    %cst_18 = arith.constant 1.000000e+00 : f32
    %26 = vector.broadcast %cst_18 : f32 to vector<1x2xf32>
    %27 = arith.addf %26, %25 : vector<1x2xf32>
    %28 = tpu.reciprocal %27 : vector<1x2xf32> -> vector<1x2xf32>
    %c0_19 = arith.constant 0 : index
    %c0_20 = arith.constant 0 : index
    %29 = vector.load %arg8[%c0_19, %c0_20] : memref<1x2xf32, #tpu.memory_space<vmem>>, vector<1x2xf32>
    tpu.vector_store %arg8[%c0_19, %c0_20], %28 {strides = array<i32>} : memref<1x2xf32, #tpu.memory_space<vmem>>, vector<1x2xf32>,
    return
  }
  func.func @transform_0(%arg0: i32) -> (i32, i32) {
    %c0_i32 = arith.constant 0 : i32
    %c0_i32_0 = arith.constant 0 : i32
    return %c0_i32, %arg0 : i32, i32
  }
  func.func @transform_1(%arg0: i32) -> (i32, i32) {
    %c0_i32 = arith.constant 0 : i32
    %c0_i32_0 = arith.constant 0 : i32
    %c0_i32_1 = arith.constant 0 : i32
    return %c0_i32, %c0_i32_0 : i32, i32
  }
  func.func @transform_2(%arg0: i32) -> (i32, i32) {
    %c0_i32 = arith.constant 0 : i32
    %c0_i32_0 = arith.constant 0 : i32
    %c0_i32_1 = arith.constant 0 : i32
    return %c0_i32, %c0_i32_0 : i32, i32
  }
  func.func @transform_3(%arg0: i32) -> (i32, i32) {
    %c0_i32 = arith.constant 0 : i32
    %c0_i32_0 = arith.constant 0 : i32
    %c0_i32_1 = arith.constant 0 : i32
    return %c0_i32, %c0_i32_0 : i32, i32
  }
  func.func @transform_4(%arg0: i32) -> (i32, i32) {
    %c0_i32 = arith.constant 0 : i32
    %c0_i32_0 = arith.constant 0 : i32
    %c0_i32_1 = arith.constant 0 : i32
    return %c0_i32, %c0_i32_0 : i32, i32
  }
  func.func @transform_5(%arg0: i32) -> (i32, i32) {
    %c0_i32 = arith.constant 0 : i32
    %c0_i32_0 = arith.constant 0 : i32
    %c0_i32_1 = arith.constant 0 : i32
    return %c0_i32, %c0_i32_0 : i32, i32
  }
  func.func @transform_6(%arg0: i32) -> (i32, i32) {
    %c0_i32 = arith.constant 0 : i32
    %c0_i32_0 = arith.constant 0 : i32
    %c0_i32_1 = arith.constant 0 : i32
    return %c0_i32, %c0_i32_0 : i32, i32
  }
  func.func @transform_7(%arg0: i32) -> (i32, i32) {
    %c0_i32 = arith.constant 0 : i32
    %c0_i32_0 = arith.constant 0 : i32
    return %c0_i32, %arg0 : i32, i32
  }
}

</mosaic_0001>

<bundles_post_ra>
// kernel: fcn_var_forward.1
= control target key start
LH: loop header
LB: loop body
LE: loop exit
PB: predicated region body
PF: predicated region fallthrough
CT: control target
= control target key end

     0   :  { %s598_s0 = inlined_call_operand.vmem [shape: f32[56,2], index: 0, kind: input, shape index: {}]   ;;  %s599_s1 = inlined_call_operand.vmem [shape: f32[32,56], index: 1, kind: input, shape index: {}]   ;;  %s600_s2 = inlined_call_operand.vmem [shape: f32[32,1], index: 2, kind: input, shape index: {}]   ;;  %s601_s3 = inlined_call_operand.vmem [shape: f32[32,32], index: 3, kind: input, shape index: {}]   ;;  %s602_s4 = inlined_call_operand.vmem [shape: f32[32,1], index: 4, kind: input, shape index: {}]   ;;  %s603_s5 = inlined_call_operand.vmem [shape: f32[32,1], index: 5, kind: input, shape index: {}]   ;;  %s604_s6 = inlined_call_operand.<no memory space> [shape: f32[1,1], index: 6, kind: input, shape index: {}]   ;;  %s605_s7 = inlined_call_operand.hbm [shape: f32[1,2], index: 7, kind: output, shape index: {}]  }
   0x1   :  { %v12_v0 = vstv %s604_s6 }
   0x2   :  { %13 = vst [vmem:[#allocation2] sm:$0x1] %v12_v0 }
   0x3   :  { %v39_v1 = vld [vmem:[%s598_s0 + $0x30] sm:$0xff]  ;;  %v38_v2 = vld [vmem:[%s598_s0 + $0x28] sm:$0xff]  ;;  %vm64_vm0 = vcmask 457728   ;;  %v461_v3 = vmov 0   ;;  %v37_v4 = vld [vmem:[%s598_s0 + $0x20] sm:$0xff] }
   0x4   :  { %397 = vmatprep.subr.mxu0 %v39_v1  ;;  %433 = vset.pattern.permute.xlu0 %v461_v3  ;;  %v29_v5 = vld [vmem:[%s599_s1] sm:$0xff]  ;;  %v43_v6 = vld [vmem:[%s600_s2 + $0x18] sm:$0xff]  ;;  %v41_v8 = vld [vmem:[%s600_s2 + $0x8] sm:$0xff] }
   0x5   :  { %398 = vmatpush3.msra.mxu0 %v39_v1  ;;  %434 = vset.pattern.permute.xlu1 %v461_v3  ;;  %v36_v7 = vld [vmem:[%s598_s0 + $0x18] sm:$0xff]  ;;  %v42_v9 = vld [vmem:[%s600_s2 + $0x10] sm:$0xff]  ;;  %v40_v11 = vld [vmem:[%s600_s2] sm:$0xff] }
   0x6   :  { %399 = vmatprep.subr.mxu0 %v38_v2  ;;  %411 = vmatprep.mubr.msk.f32.mxu0 %vm64_vm0, %v29_v5  ;;  %v35_v10 = vld [vmem:[%s598_s0 + $0x10] sm:$0xff]  ;;  %v34_v12 = vld [vmem:[%s598_s0 + $0x8] sm:$0xff] }
   0x7   :  { %400 = vmatpush3.msra.mxu0 %v38_v2  ;;  %61 = vperm.xlu0 %433, %v43_v6  }
   0x8   :  { %401 = vmatprep.subr.mxu0 %v37_v4  ;;  %51 = vperm.xlu1 %434, %v41_v8  }
   0x9   :  { %402 = vmatpush3.msra.mxu0 %v37_v4 }
   0xa   :  { %403 = vmatprep.subr.mxu0 %v36_v7 }
   0xb   :  { %404 = vmatpush3.msra.mxu0 %v36_v7  ;;  %56 = vperm.xlu0 %433, %v42_v9  }
   0xc   :  { %14 = vsyncpa [#allocation4], 0  ;;  %405 = vmatprep.subr.mxu0 %v35_v10  ;;  %v170_v13 = vld [vmem:[%s602_s4] sm:$0xff]  ;;  %46 = vperm.xlu1 %434, %v40_v11   ;;  %v171_v15 = vld [vmem:[%s602_s4 + $0x8] sm:$0xff]  ;;  %vm194_vm1 = vcmask 261120   ;;  %vm324_vm2 = vcmask 15360  }
   0xd   :  { %406 = vmatpush3.msra.mxu0 %v35_v10  ;;  %v33_v14 = vld [vmem:[%s598_s0] sm:$0xff]  ;;  %v30_v16 = vld [vmem:[%s599_s1 + $0x8] sm:$0xff]  ;;  %v31_v17 = vld [vmem:[%s599_s1 + $0x10] sm:$0xff]  ;;  %vm354_vm3 = vcmask 8192  }
   0xe   :  { %407 = vmatprep.subr.mxu0 %v34_v12  ;;  %v172_v18 = vld [vmem:[%s602_s4 + $0x10] sm:$0xff]  ;;  %v173_v19 = vld [vmem:[%s602_s4 + $0x18] sm:$0xff]  ;;  %v296_v21 = vld [vmem:[%s603_s5] sm:$0xff] }
   0xf   :  { %408 = vmatpush3.msra.mxu0 %v34_v12  ;;  %176 = vperm.xlu0 %433, %v170_v13   ;;  %v32_v20 = vld [vmem:[%s599_s1 + $0x18] sm:$0xff]  ;;  %v297_v22 = vld [vmem:[%s603_s5 + $0x8] sm:$0xff]  ;;  %v298_v23 = vld [vmem:[%s603_s5 + $0x10] sm:$0xff]  ;;  %v344_v12 = vlaneseq }
  0x10   :  { %409 = vmatprep.subr.mxu0 %v33_v14  ;;  %181 = vperm.xlu1 %434, %v171_v15   ;;  %v299_v24 = vld [vmem:[%s603_s5 + $0x18] sm:$0xff]  ;;  %v338_v25 = vld [vmem:[#allocation2] sm:$0x1]  ;;  %v167_v43 = vld [vmem:[%s601_s3 + $0x8] sm:$0xff] }
  0x11   :  { %410 = vmatpush3.msra.mxu0 %v33_v14  ;;  %v166_v26 = vld [vmem:[%s601_s3] sm:$0xff]  ;;  %v168_v44 = vld [vmem:[%s601_s3 + $0x10] sm:$0xff]  ;;  %v169_v45 = vld [vmem:[%s601_s3 + $0x18] sm:$0xff]  ;;  %v345_v15 = vshrl.u32 %v344_v12, 7  ;;  %s462_s3 = smov [#allocation3]  }
  0x12   :  { %412 = vmatmul.mubr.msk.f32.vlgmr.msra.gmra.mxu0 %vm64_vm0, %v30_v16  ;;  %425 = vmatprep.mubr.msk.f32.mxu1 %vm194_vm1, %v166_v26  ;;  %s362_s27 = sshll.u32 %s462_s3, 4  ;;  %s363_s27 = int_to_ptr.vmem [resolvable:$true] %s362_s27 }
  0x13   :  { %414 = vmatprep.mubr.msk.f32.mxu0 %vm64_vm0, %v31_v17  ;;  %186 = vperm.xlu0 %433, %v172_v18   ;;  %v346_v18 = vsub.s32 0, %v345_v15  ;;  %s439_s2 = scalar_lea.vmem %s363_s27, 16  ;;  %s443_s28 = scalar_lea.vmem %s363_s27, 32 }
  0x14   :  { %191 = vperm.xlu1 %434, %v173_v19   ;;  %p440_p0 = scmp.ne.s32.totalorder %s363_s27, %s439_s2  ;;  %p444_p1 = scmp.lt.s32.totalorder %s363_s27, %s363_s27 }
  0x15   :  { %p445_p2 = scmp.lt.s32.totalorder %s443_s28, %s439_s2 }
  0x16   :  { %415 = vmatmul.mubr.msk.f32.gmra.mxu0 %vm64_vm0, %v32_v20 }
  0x17   :  { %302 = vperm.xlu0 %433, %v296_v21   ;;  %p446_p3 = por %p445_p2, %p444_p1 }
  0x18   :  { %307 = vperm.xlu1 %434, %v297_v22  }
  0x19   :  { %p447_p4 = pnand %p446_p3, %p440_p0 }
  0x1b   :  { %312 = vperm.xlu0 %433, %v298_v23  }
  0x1c   :  { %317 = vperm.xlu1 %434, %v299_v24  }
  0x1f   :  { %341 = vperm.xlu0 %433, %v338_v25  }
  0x82   :  { %v62_v27 = vpop.permute.xlu0 %61 }
  0x83   :  { %v52_v29 = vpop.permute.xlu1 %51 }
  0x86   :  { %v57_v33 = vpop.permute.xlu0 %56 }
  0x87   :  { %v47_v38 = vpop.permute.xlu1 %46 }
  0x8a   :  { %v177_v46 = vpop.permute.xlu0 %176 }
  0x8b   :  { %v182_v47 = vpop.permute.xlu1 %181 }
  0x8e   :  { %v187_v48 = vpop.permute.xlu0 %186 }
  0x8f   :  { %v192_v49 = vpop.permute.xlu1 %191 }
  0x92   :  { %v303_v53 = vpop.permute.xlu0 %302 }
  0x93   :  { %v308_v56 = vpop.permute.xlu1 %307 }
  0x96   :  { %v313_v3 = vpop.permute.xlu0 %312 }
  0x97   :  { %v318_v4 = vpop.permute.xlu1 %317 }
  0x9a   :  { %v342_v20 = vpop.permute.xlu0 %341 }
  0x9b   :  { %v347_v22 = vrot.slane %v342_v20, %v346_v18 }
  0xd2   :  { %v413_v28 = vpop.f32.mrf.mxu0 }
  0xd3   :  { %v149_v35 = vadd.f32 %v413_v28, %v52_v29 }
  0xd4   :  { %v143_v30 = vpop.f32.mrf.mxu0 }
  0xd5   :  { %v144_v39 = vadd.f32 %v143_v30, %v47_v38  ;;  %v163_v41 = vmax.f32 %v149_v35, 0.0 }
  0xd6   :  { %v416_v31 = vpop.f32.mrf.mxu0 }
  0xd7   :  { %v159_v32 = vadd.f32 %v416_v31, %v62_v27  ;;  %v162_v42 = vmax.f32 %v144_v39, 0.0 }
  0xd8   :  { %v153_v34 = vpop.f32.mrf.mxu0 }
  0xd9   :  { %v165_v36 = vmax.f32 %v159_v32, 0.0  ;;  %v154_v37 = vadd.f32 %v153_v34, %v57_v33 }
  0xdb   :  { %v164_v40 = vmax.f32 %v154_v37, 0.0  ;;  %417 = vmatprep.subr.mxu1 %v165_v36 }
  0xdc   :  { %418 = vmatpush3.msra.mxu1 %v165_v36 }
  0xdd   :  { %419 = vmatprep.subr.mxu1 %v164_v40 }
  0xde   :  { %420 = vmatpush3.msra.mxu1 %v164_v40 }
  0xdf   :  { %421 = vmatprep.subr.mxu1 %v163_v41 }
  0xe0   :  { %422 = vmatpush3.msra.mxu1 %v163_v41 }
  0xe1   :  { %423 = vmatprep.subr.mxu1 %v162_v42 }
  0xe2   :  { %424 = vmatpush3.msra.mxu1 %v162_v42 }
  0xe3   :  { %426 = vmatmul.mubr.msk.f32.vlgmr.msra.gmra.mxu1 %vm194_vm1, %v167_v43 }
  0xe4   :  { %428 = vmatprep.mubr.msk.f32.mxu1 %vm194_vm1, %v168_v44 }
  0xe7   :  { %429 = vmatmul.mubr.msk.f32.gmra.mxu1 %vm194_vm1, %v169_v45 }
 0x1a3   :  { %v427_v50 = vpop.f32.mrf.mxu1 }
 0x1a4   :  { %v279_v51 = vadd.f32 %v427_v50, %v182_v47 }
 0x1a5   :  { %v273_v52 = vpop.f32.mrf.mxu1 }
 0x1a6   :  { %v293_v54 = vmax.f32 %v279_v51, 0.0  ;;  %v274_v55 = vadd.f32 %v273_v52, %v177_v46 }
 0x1a7   :  { %v430_v57 = vpop.f32.mrf.mxu1 }
 0x1a8   :  { %v292_v58 = vmax.f32 %v274_v55, 0.0  ;;  %v289_v59 = vadd.f32 %v430_v57, %v192_v49  ;;  %v321_v61 = vmul.f32 %v308_v56, %v293_v54 }
 0x1a9   :  { %v283_v60 = vpop.f32.mrf.mxu1 }
 0x1aa   :  { %v320_v62 = vmul.f32 %v303_v53, %v292_v58  ;;  %v295_v63 = vmax.f32 %v289_v59, 0.0  ;;  %v284_v0 = vadd.f32 %v283_v60, %v187_v48  ;;  %v326_v5 = vsel %vm324_vm2, %v321_v61, 0.0 }
 0x1ac   :  { %v325_v1 = vsel %vm324_vm2, %v320_v62, 0.0  ;;  %v294_v2 = vmax.f32 %v284_v0, 0.0  ;;  %v323_v6 = vmul.f32 %v318_v4, %v295_v63 }
 0x1ad   :  { %v327_v8 = vadd.f32 %v326_v5, %v325_v1 }
 0x1ae   :  { %v322_v7 = vmul.f32 %v313_v3, %v294_v2  ;;  %v330_v11 = vsel %vm324_vm2, %v323_v6, 0.0 }
 0x1b0   :  { %v328_v9 = vsel %vm324_vm2, %v322_v7, 0.0 }
 0x1b1   :  { %v329_v10 = vadd.f32 %v328_v9, %v327_v8 }
 0x1b3   :  { %v331_v13 = vadd.f32 %v330_v11, %v329_v10 }
 0x1b5   :  { %v332_v14 = vrot.slane %v331_v13, 4 }
 0x1b7   :  { %v333_v16 = vadd.f32 %v332_v14, %v331_v13 }
 0x1b9   :  { %v334_v17 = vrot.slane %v333_v16, 2 }
 0x1bb   :  { %v335_v19 = vadd.f32 %v334_v17, %v333_v16 }
 0x1bd   :  { %v336_v21 = vrot.slane %v335_v19, 1 }
 0x1bf   :  { %v337_v23 = vadd.f32 %v336_v21, %v335_v19 }
 0x1c1   :  { %v348_v24 = vadd.f32 %v347_v22, %v337_v23 }
 0x1c3   :  { %v349_v25 = vsub.f32 0.0, %v348_v24 }
 0x1c5   :  { %v350_v26 = vmul.f32 1.442695, %v349_v25 }
 0x1c7   :  { %435 = vpow2.f32 %v350_v26 }
 0x1d4   :  { %v436_v27 = vpop.eup %435 }
 0x1d5   :  { %v352_v28 = vadd.f32 1.0, %v436_v27 }
 0x1d7   :  { %437 = vrcp.f32 %v352_v28 }
 0x1e4   :  { %v438_v29 = vpop.eup %437 }
 0x1e5   :  { %355 = vst.msk [vmem:[#allocation3] sm:$0x1] %vm354_vm3, %v438_v29 }
 0x1e6   :  { %450 = shalt.err (!%p447_p4)
}
 0x1e7   :  { %365 = dma.vmem_to_hbm [thread:$0]  %s363_s27, 16, %s605_s7, [#allocation4]  }
 0x1e8   :  { %459 = dma.done.wait [#allocation4], 16  }
 0x1e9   :  { %460 = vsyncadd [#allocation4], 4294967280 }
 0x1ea   :  { %369 = vsyncpa [#allocation4], 1 }

</bundles_post_ra>
